<compile_context>
chip_gen: v6e
topology: v6e:2x2x1
jax: 0.10.0
libtpu: 0.0.40
codegen_flags: <defaults>
</compile_context>

<pallas_src>
import functools
import math

import jax
import jax.numpy as jnp
from jax.experimental import pallas as pl
from jax.experimental.pallas import tpu as pltpu


def _round_up(x, m):
    return (x + m - 1) // m * m


def _equalized_linear_kernel(x_ref, w_ref, b_ref, o_ref, acc_ref, *, c, compute_dtype):
    k = pl.program_id(2)

    @pl.when(k == 0)
    def _():
        acc_ref[...] = jnp.zeros_like(acc_ref)

    # MXU matmul in compute_dtype (bf16 by default) with f32 accumulation.
    # w_ref is already [tk, tn] in compute_dtype; astype on it is a no-op.
    acc_ref[...] += jnp.dot(
        x_ref[...].astype(compute_dtype),
        w_ref[...].astype(compute_dtype),
        preferred_element_type=jnp.float32,
    )

    @pl.when(k == pl.num_programs(2) - 1)
    def _():
        # Fused epilogue: equalized-LR scale c + bias, cast to output dtype.
        o_ref[...] = (acc_ref[...] * c + b_ref[...].astype(jnp.float32)).astype(o_ref.dtype)


def equalized_linear(x, weight, bias, *, tm=512, tn=512, tk=1024,
                     compute_dtype=jnp.bfloat16):
    """Pallas TPU EqualizedLinear.forward: x @ (weight*c).T + bias, c=1/sqrt(in_planes)."""
    orig_shape = x.shape
    K = int(orig_shape[-1])
    N, Kw = int(weight.shape[0]), int(weight.shape[1])
    assert Kw == K, f"in_planes mismatch: x has {K}, weight has {Kw}"

    M = 1
    for s in orig_shape[:-1]:
        M *= int(s)
    x2 = x.reshape(M, K)

    c = 1.0 / math.sqrt(float(K))

    x_itemsize = jnp.dtype(x.dtype).itemsize
    w_itemsize = jnp.dtype(compute_dtype).itemsize
    b_itemsize = jnp.dtype(bias.dtype).itemsize

    # Sublane multiple depends on dtype packing: f32 -> 8, bf16 -> 16, int8/fp8 -> 32.
    sub = {4: 8, 2: 16, 1: 32}.get(x_itemsize, 8)

    # Clamp tiles to the (aligned) problem size.  Lane dims stay multiples of 128,
    # sublane dims multiples of the packing factor.
    tm = min(tm, _round_up(M, sub))
    tn = min(tn, _round_up(N, 128))
    tk = min(tk, _round_up(K, 128))
    Kp = _round_up(K, tk)

    # v7x megacore: make sure there are at least 2 parallel output tiles when the
    # problem allows it, so both TensorCores get work.
    if pl.cdiv(M, tm) * pl.cdiv(N, tn) < 2:
        if N > 128:
            tn = max(128, _round_up(pl.cdiv(N, 2), 128))
        elif M > sub:
            tm = max(sub, _round_up(pl.cdiv(M, 2), sub))

    # One-time weight transform: [N, K] -> [K, N] in the compute dtype (single
    # HBM pass, amortized over the whole grid; halves streamed weight bytes when
    # compute_dtype is bf16).  Zero-pad only the contraction dim if ragged.
    w_kn = weight.T.astype(compute_dtype)
    if Kp != K:
        w_kn = jnp.pad(w_kn, ((0, Kp - K), (0, 0)))
        x2 = jnp.pad(x2, ((0, 0), (0, Kp - K)))
    b2 = bias.reshape(1, N)

    m_tiles = pl.cdiv(M, tm)
    n_tiles = pl.cdiv(N, tn)
    k_tiles = Kp // tk
    grid = (m_tiles, n_tiles, k_tiles)

    # Explicit VMEM budget (double-buffered inputs/outputs + f32 accumulator),
    # kept under v7x's 64 MiB per-TC VMEM; v5e/v6e have 128 MiB so this is safe
    # everywhere.
    vmem_needed = (
        2 * (tm * tk * x_itemsize + tk * tn * w_itemsize + tn * b_itemsize
             + tm * tn * x_itemsize)
        + tm * tn * 4
    )
    vmem_limit = min(64 * 1024 * 1024,
                     max(32 * 1024 * 1024, int(vmem_needed * 3 // 2)))

    out = pl.pallas_call(
        functools.partial(_equalized_linear_kernel, c=c, compute_dtype=compute_dtype),
        out_shape=jax.ShapeDtypeStruct((M, N), x.dtype),
        grid=grid,
        in_specs=[
            pl.BlockSpec((tm, tk), lambda i, j, k: (i, k)),   # x  [M, Kp]
            pl.BlockSpec((tk, tn), lambda i, j, k: (k, j)),   # w  [Kp, N] (pre-transposed)
            pl.BlockSpec((1, tn), lambda i, j, k: (0, j)),    # bias [1, N]
        ],
        out_specs=pl.BlockSpec((tm, tn), lambda i, j, k: (i, j)),
        scratch_shapes=[pltpu.VMEM((tm, tn), jnp.float32)],
        compiler_params=pltpu.CompilerParams(
            dimension_semantics=("parallel", "parallel", "arbitrary"),
            vmem_limit_bytes=vmem_limit,
        ),
        cost_estimate=pl.CostEstimate(
            flops=2 * M * N * Kp,
            transcendentals=0,
            bytes_accessed=(
                M * Kp * x_itemsize * n_tiles      # x re-read once per N tile
                + Kp * N * w_itemsize * m_tiles    # w re-read once per M tile
                + N * b_itemsize * m_tiles         # bias re-read once per M tile
                + M * N * x_itemsize               # output written once
            ),
        ),
    )(x2, w_kn, b2)

    return out.reshape(*orig_shape[:-1], N)


if __name__ == "__main__":
    # Small deterministic example mirroring EqualizedLinear(in_planes, out_planes, bias=0.1).
    in_planes, out_planes = 384, 192
    lead = (2, 12)  # x: [2, 12, in_planes] -> flattened M = 24

    key = jax.random.PRNGKey(0)
    kw, kb, kx = jax.random.split(key, 3)

    weight = jax.random.normal(kw, (out_planes, in_planes), dtype=jnp.float32)  # N(0,1) init
    bias = jax.random.normal(kb, (out_planes,), dtype=jnp.float32) * 0.1        # bias=0.1
    x = jax.random.normal(kx, (*lead, in_planes), dtype=jnp.float32)

    out = jax.block_until_ready(equalized_linear(x, weight, bias))

    c = 1.0 / math.sqrt(float(in_planes))

    # Semantic reference in full f32 (loose tolerance covers the bf16 MXU path).
    ref_f32 = jnp.einsum("...k,nk->...n", x, weight * c,
                         precision=jax.lax.Precision.HIGHEST) + bias
    # Precision-matched reference (bf16 inputs, f32 accumulation), tight tolerance.
    ref_bf16 = (jnp.einsum("...k,kn->...n",
                           x.astype(jnp.bfloat16), weight.T.astype(jnp.bfloat16),
                           preferred_element_type=jnp.float32) * c + bias).astype(x.dtype)

    assert out.shape == (*lead, out_planes)
    assert out.dtype == x.dtype
    assert jnp.allclose(out, ref_f32, atol=5e-2, rtol=5e-2), \
        float(jnp.max(jnp.abs(out - ref_f32)))
    assert jnp.allclose(out, ref_bf16, atol=1e-2, rtol=1e-2), \
        float(jnp.max(jnp.abs(out - ref_bf16)))

    print("KERNEL_OK")
</pallas_src>

<mosaic_0001>
module attributes {stable_mosaic.version = 11 : i64} {
  func.func @_equalized_linear_kernel(%arg0: i32, %arg1: i32, %arg2: i32, %arg3: memref<24x384xf32, #tpu.memory_space<vmem>>, %arg4: memref<384x128xbf16, #tpu.memory_space<vmem>>, %arg5: memref<1x128xf32, #tpu.memory_space<vmem>>, %arg6: memref<24x128xf32, #tpu.memory_space<vmem>>, %arg7: memref<24x128xf32, #tpu.memory_space<vmem>>) attributes {dimension_semantics = [#tpu.dimension_semantics<parallel>, #tpu.dimension_semantics<parallel>, #tpu.dimension_semantics<arbitrary>], iteration_bounds = array<i64: 1, 2, 1>, scalar_prefetch = 0 : i64, scratch_operands = 1 : i64, tpu.core_type = #tpu.core_type<tc>, window_params = [{transform_indices = @transform_0, window_bounds = array<i64: 24, 384>}, {transform_indices = @transform_1, window_bounds = array<i64: 384, 128>}, {transform_indices = @transform_2, window_bounds = array<i64: 1, 128>}, {transform_indices = @transform_3, window_bounds = array<i64: 24, 128>}]} {
    %c0_i32 = arith.constant 0 : i32
    %0 = arith.cmpi eq, %arg2, %c0_i32 : i32
    %1 = arith.extui %0 : i1 to i32
    %c0_i32_0 = arith.constant 0 : i32
    %2 = arith.cmpi ne, %1, %c0_i32_0 : i32
    scf.if %2 {
      %cst_10 = arith.constant 0.000000e+00 : f32
      %13 = vector.broadcast %cst_10 : f32 to vector<24x128xf32>
      %c0_11 = arith.constant 0 : index
      %c0_12 = arith.constant 0 : index
      %14 = vector.load %arg7[%c0_11, %c0_12] : memref<24x128xf32, #tpu.memory_space<vmem>>, vector<24x128xf32>
      tpu.vector_store %arg7[%c0_11, %c0_12], %13 {strides = array<i32>} : memref<24x128xf32, #tpu.memory_space<vmem>>, vector<24x128xf32>,
    } else {
    }
    %c0 = arith.constant 0 : index
    %c0_1 = arith.constant 0 : index
    %3 = vector.load %arg7[%c0, %c0_1] : memref<24x128xf32, #tpu.memory_space<vmem>>, vector<24x128xf32>
    %c0_2 = arith.constant 0 : index
    %c0_3 = arith.constant 0 : index
    %4 = vector.load %arg3[%c0_2, %c0_3] : memref<24x384xf32, #tpu.memory_space<vmem>>, vector<24x384xf32>
    %5 = arith.truncf %4 : vector<24x384xf32> to vector<24x384xbf16>
    %c0_4 = arith.constant 0 : index
    %c0_5 = arith.constant 0 : index
    %6 = vector.load %arg4[%c0_4, %c0_5] : memref<384x128xbf16, #tpu.memory_space<vmem>>, vector<384x128xbf16>
    %cst = arith.constant dense<0.000000e+00> : vector<24x128xf32>
    %7 = tpu.matmul %5, %6, %cst {dimension_numbers = #tpu.dot_dimension_numbers<[1], [0], [0], [1], [0, 0, 1, 1], [], []>} : vector<24x384xbf16>, vector<384x128xbf16>, vector<24x128xf32> -> vector<24x128xf32>
    %8 = arith.addf %3, %7 : vector<24x128xf32>
    %c0_6 = arith.constant 0 : index
    %c0_7 = arith.constant 0 : index
    %9 = vector.load %arg7[%c0_6, %c0_7] : memref<24x128xf32, #tpu.memory_space<vmem>>, vector<24x128xf32>
    tpu.vector_store %arg7[%c0_6, %c0_7], %8 {strides = array<i32>} : memref<24x128xf32, #tpu.memory_space<vmem>>, vector<24x128xf32>,
    %c0_i32_8 = arith.constant 0 : i32
    %10 = arith.cmpi eq, %arg2, %c0_i32_8 : i32
    %11 = arith.extui %10 : i1 to i32
    %c0_i32_9 = arith.constant 0 : i32
    %12 = arith.cmpi ne, %11, %c0_i32_9 : i32
    scf.if %12 {
      %c0_10 = arith.constant 0 : index
      %c0_11 = arith.constant 0 : index
      %13 = vector.load %arg7[%c0_10, %c0_11] : memref<24x128xf32, #tpu.memory_space<vmem>>, vector<24x128xf32>
      %cst_12 = arith.constant 0.0510310382 : f32
      %14 = vector.broadcast %cst_12 : f32 to vector<24x128xf32>
      %15 = arith.mulf %13, %14 : vector<24x128xf32>
      %c0_13 = arith.constant 0 : index
      %c0_14 = arith.constant 0 : index
      %16 = vector.load %arg5[%c0_13, %c0_14] : memref<1x128xf32, #tpu.memory_space<vmem>>, vector<1x128xf32>
      %17 = vector.broadcast %16 : vector<1x128xf32> to vector<24x128xf32>
      %18 = arith.addf %15, %17 : vector<24x128xf32>
      %c0_15 = arith.constant 0 : index
      %c0_16 = arith.constant 0 : index
      %19 = vector.load %arg6[%c0_15, %c0_16] : memref<24x128xf32, #tpu.memory_space<vmem>>, vector<24x128xf32>
      tpu.vector_store %arg6[%c0_15, %c0_16], %18 {strides = array<i32>} : memref<24x128xf32, #tpu.memory_space<vmem>>, vector<24x128xf32>,
    } else {
    }
    return
  }
  func.func @transform_0(%arg0: i32, %arg1: i32, %arg2: i32) -> (i32, i32) {
    %c0_i32 = arith.constant 0 : i32
    return %arg0, %arg2 : i32, i32
  }
  func.func @transform_1(%arg0: i32, %arg1: i32, %arg2: i32) -> (i32, i32) {
    %c0_i32 = arith.constant 0 : i32
    return %arg2, %arg1 : i32, i32
  }
  func.func @transform_2(%arg0: i32, %arg1: i32, %arg2: i32) -> (i32, i32) {
    %c0_i32 = arith.constant 0 : i32
    %c0_i32_0 = arith.constant 0 : i32
    return %c0_i32, %arg1 : i32, i32
  }
  func.func @transform_3(%arg0: i32, %arg1: i32, %arg2: i32) -> (i32, i32) {
    %c0_i32 = arith.constant 0 : i32
    return %arg0, %arg1 : i32, i32
  }
}

</mosaic_0001>

<bundles_post_ra>
// kernel: tpu_custom_call.1
= control target key start
LH: loop header
LB: loop body
LE: loop exit
PB: predicated region body
PF: predicated region fallthrough
CT: control target
= control target key end

     0   :  { %8 = vsyncpa [#allocation5], 0  ;;  %s1515_s0 = inlined_call_operand.vmem [shape: f32[24,384], index: 0, kind: input, shape index: {}]   ;;  %s1516_s1 = inlined_call_operand.vmem [shape: bf16[384,192], index: 1, kind: input, shape index: {}]   ;;  %s1517_s2 = inlined_call_operand.vmem [shape: f32[1,192], index: 2, kind: input, shape index: {}]   ;;  %s1518_s3 = inlined_call_operand.hbm [shape: f32[24,192], index: 3, kind: output, shape index: {}]  }
   0x1   :  { %10 = vsyncpa [#allocation5 + $0x1], 0  ;;  %s1234_s12 = smov 0   ;;  %s1236_s13 = smov 0  }
   0x2   :  { %s1238_s14 = smov 0   ;;  %s1240_s15 = smov 0  }
   0x3   :  { %s1242_s16 = smov 0   ;;  %s1244_s17 = smov 0  }
   0x4 LB: > { %s954_s18 = sadd.s32 4294967295, %s1208_s17   ;;  %s955_s19 = sadd.s32 4294967294, %s1208_s17   ;;  %s1208_s17 = sphi %s1244_s17, %s16_s17   ;;  %s1204_s16 = sphi %s1242_s16, %s1525_s16   ;;  %s1200_s15 = sphi %s1240_s15, %s1524_s15   ;;  %s1196_s14 = sphi %s1238_s14, %s1523_s14   ;;  %s1192_s13 = sphi %s1236_s13, %s1522_s13   ;;  %s1188_s12 = sphi %s1234_s12, %s1521_s12  }
   0x5   : > { %s31_s20 = sadd.s32 1, %s1204_s16  ;;  %s72_s21 = sadd.s32 1, %s1196_s14 }
   0x6   : > { %p33_p0 = scmp.ge.s32.totalorder %s31_s20, 2  ;;  %p79_p1 = scmp.ne.s32.totalorder %s1196_s14, %s1192_s13 }
   0x7   : > { %p80_p2 = scmp.eq.s32.totalorder %s1208_s17, 0  ;;  %p137_p3 = scmp.eq.s32.totalorder %s954_s18, 1 }
   0x8   : > { %s1527_s20 = smov (%p33_p0, %s31_s20), 0  ;;  %p142_p6 = scmp.ne.s32.totalorder %s1192_s13, %s1188_s12 }
   0x9   : > { %p81_p4 = por %p80_p2, %p79_p1  ;;  %p1273_p5 = por %p137_p3, %p79_p1 }
   0xa   : > { %s68_s23 = ssub.s32 %s1204_s16, %s1527_s20  ;;  %p143_p8 = scmp.eq.s32.totalorder %s955_s19, 1 }
   0xb   : > { %p70_p7 = scmp.eq.s32.totalorder %s68_s23, 0  ;;  %p958_p10 = scmp.ge.s32.totalorder %s1208_s17, 2 }
   0xc   : > { %p1284_p9 = por %p143_p8, %p142_p6 }
   0xd   : > { %s1282_s24 = scalar_select %p70_p7, %s1196_s14, %s72_s21  }
   0xe   : > { %174 = sbr.rel (%p958_p10) target bundleno = 55 (0x37), region = 20 }
  0x13   : > { %177 = sbr.rel (!%p81_p4) target bundleno = 55 (0x37), region = 24  ;;  %s179_s26 = sand.u32 (%p81_p4), 1, %s1196_s14  }
  0x14   : > { %s959_s27 = sshll.u32 (%p81_p4), %s1204_s16, 2  ;;  %s1047_s28 = smul.u32 (%p81_p4), 192, %s179_s26 }
  0x15   : > { %s1296_s4 = scalar_lea.vmem (%p81_p4), %s1516_s1, %s959_s27 }
  0x16   : > { %v203_v0 = vld [vmem:[%s1296_s4] sm:$0xf] (%p81_p4)  ;;  %v205_v1 = vld [vmem:[%s1296_s4 + $0x8] sm:$0xf] (%p81_p4)  ;;  %v207_v2 = vld [vmem:[%s1296_s4 + $0x10] sm:$0xf] (%p81_p4) }
  0x17   : > { %v209_v3 = vld [vmem:[%s1296_s4 + $0x18] sm:$0xf] (%p81_p4)  ;;  %v211_v4 = vld [vmem:[%s1296_s4 + $0x20] sm:$0xf] (%p81_p4)  ;;  %s1303_s5 = scalar_lea.vmem (%p81_p4), [#allocation3], %s1047_s28 }
  0x18   : > { %204 = vst [vmem:[%s1303_s5] sm:$0xf] %v203_v0  ;;  %206 = vst [vmem:[%s1303_s5 + $0x4] sm:$0xf] %v205_v1  ;;  %v213_v5 = vld [vmem:[%s1296_s4 + $0x28] sm:$0xf] }
  0x19   : > { %208 = vst [vmem:[%s1303_s5 + $0x8] sm:$0xf] %v207_v2  ;;  %210 = vst [vmem:[%s1303_s5 + $0xc] sm:$0xf] %v209_v3  ;;  %v215_v6 = vld [vmem:[%s1296_s4 + $0x30] sm:$0xf] }
  0x1a   : > { %212 = vst [vmem:[%s1303_s5 + $0x10] sm:$0xf] %v211_v4  ;;  %v217_v7 = vld [vmem:[%s1296_s4 + $0x38] sm:$0xf]  ;;  %214 = vst [vmem:[%s1303_s5 + $0x14] sm:$0xf] %v213_v5 }
  0x1b   : > { %216 = vst [vmem:[%s1303_s5 + $0x18] sm:$0xf] %v215_v6  ;;  %218 = vst [vmem:[%s1303_s5 + $0x1c] sm:$0xf] %v217_v7  ;;  %v219_v8 = vld [vmem:[%s1296_s4 + $0x40] sm:$0xf] }
  0x1c   : > { %v221_v9 = vld [vmem:[%s1296_s4 + $0x48] sm:$0xf]  ;;  %v223_v10 = vld [vmem:[%s1296_s4 + $0x50] sm:$0xf]  ;;  %220 = vst [vmem:[%s1303_s5 + $0x20] sm:$0xf] %v219_v8 }
  0x1d   : > { %222 = vst [vmem:[%s1303_s5 + $0x24] sm:$0xf] %v221_v9  ;;  %224 = vst [vmem:[%s1303_s5 + $0x28] sm:$0xf] %v223_v10  ;;  %v225_v11 = vld [vmem:[%s1296_s4 + $0x58] sm:$0xf] }
  0x1e   : > { %v227_v12 = vld [vmem:[%s1296_s4 + $0x60] sm:$0xf]  ;;  %v229_v13 = vld [vmem:[%s1296_s4 + $0x68] sm:$0xf]  ;;  %226 = vst [vmem:[%s1303_s5 + $0x2c] sm:$0xf] %v225_v11 }
  0x1f   : > { %228 = vst [vmem:[%s1303_s5 + $0x30] sm:$0xf] %v227_v12  ;;  %230 = vst [vmem:[%s1303_s5 + $0x34] sm:$0xf] %v229_v13  ;;  %v231_v14 = vld [vmem:[%s1296_s4 + $0x70] sm:$0xf] }
  0x20   : > { %v233_v15 = vld [vmem:[%s1296_s4 + $0x78] sm:$0xf]  ;;  %v235_v16 = vld [vmem:[%s1296_s4 + $0x80] sm:$0xf]  ;;  %232 = vst [vmem:[%s1303_s5 + $0x38] sm:$0xf] %v231_v14 }
  0x21   : > { %234 = vst [vmem:[%s1303_s5 + $0x3c] sm:$0xf] %v233_v15  ;;  %236 = vst [vmem:[%s1303_s5 + $0x40] sm:$0xf] %v235_v16  ;;  %v237_v17 = vld [vmem:[%s1296_s4 + $0x88] sm:$0xf] }
  0x22   : > { %v239_v18 = vld [vmem:[%s1296_s4 + $0x90] sm:$0xf]  ;;  %v241_v19 = vld [vmem:[%s1296_s4 + $0x98] sm:$0xf]  ;;  %238 = vst [vmem:[%s1303_s5 + $0x44] sm:$0xf] %v237_v17 }
  0x23   : > { %240 = vst [vmem:[%s1303_s5 + $0x48] sm:$0xf] %v239_v18  ;;  %242 = vst [vmem:[%s1303_s5 + $0x4c] sm:$0xf] %v241_v19  ;;  %v243_v20 = vld [vmem:[%s1296_s4 + $0xa0] sm:$0xf] }
  0x24   : > { %v245_v21 = vld [vmem:[%s1296_s4 + $0xa8] sm:$0xf]  ;;  %v247_v22 = vld [vmem:[%s1296_s4 + $0xb0] sm:$0xf]  ;;  %244 = vst [vmem:[%s1303_s5 + $0x50] sm:$0xf] %v243_v20 }
  0x25   : > { %246 = vst [vmem:[%s1303_s5 + $0x54] sm:$0xf] %v245_v21  ;;  %248 = vst [vmem:[%s1303_s5 + $0x58] sm:$0xf] %v247_v22  ;;  %v249_v23 = vld [vmem:[%s1296_s4 + $0xb8] sm:$0xf] }
  0x26   : > { %v251_v24 = vld [vmem:[%s1296_s4 + $0xc0] sm:$0xf]  ;;  %v253_v25 = vld [vmem:[%s1296_s4 + $0xc8] sm:$0xf]  ;;  %250 = vst [vmem:[%s1303_s5 + $0x5c] sm:$0xf] %v249_v23 }
  0x27   : > { %252 = vst [vmem:[%s1303_s5 + $0x60] sm:$0xf] %v251_v24  ;;  %254 = vst [vmem:[%s1303_s5 + $0x64] sm:$0xf] %v253_v25  ;;  %v255_v26 = vld [vmem:[%s1296_s4 + $0xd0] sm:$0xf] }
  0x28   : > { %v257_v27 = vld [vmem:[%s1296_s4 + $0xd8] sm:$0xf]  ;;  %v259_v28 = vld [vmem:[%s1296_s4 + $0xe0] sm:$0xf]  ;;  %256 = vst [vmem:[%s1303_s5 + $0x68] sm:$0xf] %v255_v26 }
  0x29   : > { %258 = vst [vmem:[%s1303_s5 + $0x6c] sm:$0xf] %v257_v27  ;;  %260 = vst [vmem:[%s1303_s5 + $0x70] sm:$0xf] %v259_v28  ;;  %v261_v29 = vld [vmem:[%s1296_s4 + $0xe8] sm:$0xf] }
  0x2a   : > { %v263_v30 = vld [vmem:[%s1296_s4 + $0xf0] sm:$0xf]  ;;  %v265_v31 = vld [vmem:[%s1296_s4 + $0xf8] sm:$0xf]  ;;  %262 = vst [vmem:[%s1303_s5 + $0x74] sm:$0xf] %v261_v29 }
  0x2b   : > { %264 = vst [vmem:[%s1303_s5 + $0x78] sm:$0xf] %v263_v30  ;;  %266 = vst [vmem:[%s1303_s5 + $0x7c] sm:$0xf] %v265_v31  ;;  %v267_v32 = vld [vmem:[%s1296_s4 + $0x100] sm:$0xf] }
  0x2c   : > { %v269_v33 = vld [vmem:[%s1296_s4 + $0x108] sm:$0xf]  ;;  %v271_v34 = vld [vmem:[%s1296_s4 + $0x110] sm:$0xf]  ;;  %268 = vst [vmem:[%s1303_s5 + $0x80] sm:$0xf] %v267_v32 }
  0x2d   : > { %270 = vst [vmem:[%s1303_s5 + $0x84] sm:$0xf] %v269_v33  ;;  %272 = vst [vmem:[%s1303_s5 + $0x88] sm:$0xf] %v271_v34  ;;  %v273_v35 = vld [vmem:[%s1296_s4 + $0x118] sm:$0xf] }
  0x2e   : > { %v275_v36 = vld [vmem:[%s1296_s4 + $0x120] sm:$0xf]  ;;  %v277_v37 = vld [vmem:[%s1296_s4 + $0x128] sm:$0xf]  ;;  %274 = vst [vmem:[%s1303_s5 + $0x8c] sm:$0xf] %v273_v35 }
  0x2f   : > { %276 = vst [vmem:[%s1303_s5 + $0x90] sm:$0xf] %v275_v36  ;;  %278 = vst [vmem:[%s1303_s5 + $0x94] sm:$0xf] %v277_v37  ;;  %v279_v38 = vld [vmem:[%s1296_s4 + $0x130] sm:$0xf] }
  0x30   : > { %v281_v39 = vld [vmem:[%s1296_s4 + $0x138] sm:$0xf]  ;;  %v283_v40 = vld [vmem:[%s1296_s4 + $0x140] sm:$0xf]  ;;  %280 = vst [vmem:[%s1303_s5 + $0x98] sm:$0xf] %v279_v38 }
  0x31   : > { %282 = vst [vmem:[%s1303_s5 + $0x9c] sm:$0xf] %v281_v39  ;;  %284 = vst [vmem:[%s1303_s5 + $0xa0] sm:$0xf] %v283_v40  ;;  %v285_v41 = vld [vmem:[%s1296_s4 + $0x148] sm:$0xf] }
  0x32   : > { %v287_v42 = vld [vmem:[%s1296_s4 + $0x150] sm:$0xf]  ;;  %v289_v43 = vld [vmem:[%s1296_s4 + $0x158] sm:$0xf]  ;;  %286 = vst [vmem:[%s1303_s5 + $0xa4] sm:$0xf] %v285_v41 }
  0x33   : > { %288 = vst [vmem:[%s1303_s5 + $0xa8] sm:$0xf] %v287_v42  ;;  %290 = vst [vmem:[%s1303_s5 + $0xac] sm:$0xf] %v289_v43  ;;  %v291_v44 = vld [vmem:[%s1296_s4 + $0x160] sm:$0xf] }
  0x34   : > { %v293_v45 = vld [vmem:[%s1296_s4 + $0x168] sm:$0xf]  ;;  %v295_v46 = vld [vmem:[%s1296_s4 + $0x170] sm:$0xf]  ;;  %292 = vst [vmem:[%s1303_s5 + $0xb0] sm:$0xf] %v291_v44 }
  0x35   : > { %294 = vst [vmem:[%s1303_s5 + $0xb4] sm:$0xf] %v293_v45  ;;  %296 = vst [vmem:[%s1303_s5 + $0xb8] sm:$0xf] %v295_v46  ;;  %v297_v47 = vld [vmem:[%s1296_s4 + $0x178] sm:$0xf] }
  0x36   : > { %298 = vst [vmem:[%s1303_s5 + $0xbc] sm:$0xf] %v297_v47 }
  0x37 PF: > { %p960_p11 = scmp.ge.s32.totalorder %s1208_s17, 1  ;;  %p423_p12 = scmp.lt.s32.totalorder %s1208_s17, 3 }
  0x39   : > { %p424_p13 = pnand %p960_p11, %p423_p12 }
  0x3a   : > { %s1399_s6 = sand.u32 (!%p424_p13), 1, %s1192_s13   ;;  %p479_p0 = scmp.lt.s32.totalorder (!%p424_p13), %s1200_s15, 1 }
  0x3b   : > { %427 = sbr.rel (%p424_p13) target bundleno = 325 (0x145), region = 69  ;;  %s986_s28 = sshll.u32 (!%p424_p13), %s1200_s15, 7 }
  0x3c   : > { %s1048_s19 = smul.u32 (!%p424_p13), 192, %s1399_s6  ;;  %s1467_s4 = scalar_lea.hbm (!%p424_p13), %s1518_s3, %s986_s28 }
  0x3d   : > { %s1049_s23 = smul.u32 (!%p424_p13), 24, %s1399_s6  ;;  %s826_s5 = scalar_lea.sflag (!%p424_p13), [#allocation5], %s1399_s6 }
  0x3e   : > { %s1414_s26 = scalar_lea.vmem (!%p424_p13), [#allocation3], %s1048_s19 }
  0x40   : > { %v495_v48 = vld [vmem:[%s1515_s0 + $0x8] sm:$0xff]  ;;  %v498_v49 = vld [vmem:[%s1515_s0 + $0x20] sm:$0xff]  ;;  %v496_v50 = vld [vmem:[%s1515_s0 + $0x10] sm:$0xff]  ;;  %s480_s11 = scalar_select %p479_p0, %s1200_s15, 1 }
  0x41   : > { %v504_v51 = vpack.c.bf16 %v498_v49, %v495_v48  ;;  %v499_v52 = vld [vmem:[%s1515_s0 + $0x28] sm:$0xff]  ;;  %v1108_v54 = vld [vmem:[%s1414_s26 + $0x78] sm:$0xff]   ;;  %v1111_v57 = vld [vmem:[%s1414_s26 + $0x70] sm:$0xff]   ;;  %s1210_s15 = smov [#allocation4]  }
  0x42   : > { %v505_v53 = vpack.c.bf16 %v499_v52, %v496_v50  ;;  %v1109_v55 = vld [vmem:[%s1414_s26 + $0xb8] sm:$0xff]   ;;  %989 = vmatprep.subr.bf16.mxu0 %v1108_v54  ;;  %v1112_v58 = vld [vmem:[%s1414_s26 + $0xb0] sm:$0xff]   ;;  %v1114_v60 = vld [vmem:[%s1414_s26 + $0x68] sm:$0xff]   ;;  %s481_s21 = scalar_lea.vmem %s1517_s2, %s480_s11  ;;  %s1136_s8 = sshll.u32 %s1210_s15, 4  ;;  %s1137_s8 = int_to_ptr.vmem [resolvable:$false] %s1136_s8 }
  0x43   : > { %733 = vmatprep.mubr.bf16.mxu0 %v504_v51  ;;  %v1110_v56 = vld [vmem:[%s1414_s26 + $0x38] sm:$0xff]   ;;  %1027 = vmatprep.subr.bf16.mxu1 %v1109_v55  ;;  %v1113_v59 = vld [vmem:[%s1414_s26 + $0x30] sm:$0xff]   ;;  %v1115_v61 = vld [vmem:[%s1414_s26 + $0xa8] sm:$0xff]   ;;  %s1138_s9 = scalar_lea.vmem %s1137_s8, 768 }
  0x44   : > { %1043 = vmatprep.mubr.bf16.mxu1 %v505_v53  ;;  %990 = vmatpush3.bf16.msra.mxu0 %v1110_v56  ;;  %v1116_v62 = vld [vmem:[%s1414_s26 + $0x28] sm:$0xff]   ;;  %v1117_v63 = vld [vmem:[%s1414_s26 + $0x60] sm:$0xff]   ;;  %v1120_v2 = vld [vmem:[%s1414_s26 + $0x58] sm:$0xff]  }
  0x45   : > { %1028 = vmatpush3.bf16.msra.mxu1 %v1109_v55  ;;  %991 = vmatprep.subr.bf16.mxu0 %v1111_v57  ;;  %v1118_v0 = vld [vmem:[%s1414_s26 + $0xa0] sm:$0xff]   ;;  %v1121_v3 = vld [vmem:[%s1414_s26 + $0x98] sm:$0xff]   ;;  %v1123_v5 = vld [vmem:[%s1414_s26 + $0x50] sm:$0xff]  }
  0x46   : > { %1029 = vmatprep.subr.bf16.mxu1 %v1112_v58  ;;  %v1119_v1 = vld [vmem:[%s1414_s26 + $0x20] sm:$0xff]   ;;  %v1122_v4 = vld [vmem:[%s1414_s26 + $0x18] sm:$0xff]   ;;  %v1124_v6 = vld [vmem:[%s1414_s26 + $0x90] sm:$0xff]  }
  0x47   : > { %v1125_v7 = vld [vmem:[%s1414_s26 + $0x10] sm:$0xff]   ;;  %v1126_v8 = vld [vmem:[%s1414_s26 + $0x48] sm:$0xff]   ;;  %v1129_v11 = vld [vmem:[%s1414_s26 + $0x40] sm:$0xff]  }
  0x48   : > { %992 = vmatpush3.bf16.msra.mxu0 %v1113_v59  ;;  %v1127_v9 = vld [vmem:[%s1414_s26 + $0x88] sm:$0xff]   ;;  %v1130_v12 = vld [vmem:[%s1414_s26 + $0x80] sm:$0xff]   ;;  %v497_v15 = vld [vmem:[%s1515_s0 + $0x18] sm:$0xff] }
  0x49   : > { %1030 = vmatpush3.bf16.msra.mxu1 %v1112_v58  ;;  %993 = vmatprep.subr.bf16.mxu0 %v1114_v60  ;;  %v1128_v10 = vld [vmem:[%s1414_s26 + $0x8] sm:$0xff]   ;;  %v494_v13 = vld [vmem:[%s1515_s0] sm:$0xff]  ;;  %v501_v17 = vld [vmem:[%s1515_s0 + $0x38] sm:$0xff] }
  0x4a   : > { %1031 = vmatprep.subr.bf16.mxu1 %v1115_v61  ;;  %v1131_v14 = vld [vmem:[%s1414_s26] sm:$0xff]   ;;  %v503_v18 = vpack.c.bf16 %v497_v15, %v494_v13  ;;  %v507_v20 = vpack.c.bf16 %v501_v17, %v501_v17  ;;  %v500_v21 = vld [vmem:[%s1515_s0 + $0x30] sm:$0xff]  ;;  %s465_s26 = scalar_lea.vmem [#allocation4], %s1049_s23 }
  0x4b   : > { %v502_v16 = vld [vmem:[%s1515_s0 + $0x40] sm:$0xff]  ;;  %v506_v22 = vpack.c.bf16 %v500_v21, %v500_v21  ;;  %s841_s27 = sshll.u32 %s465_s26, 4  ;;  %s1462_s27 = int_to_ptr.vmem [resolvable:$true] %s841_s27 }
  0x4c   : > { %994 = vmatpush3.bf16.msra.mxu0 %v1116_v62  ;;  %v508_v19 = vpack.c.bf16 %v502_v16, %v502_v16  ;;  %v985_v31 = vld [vmem:[%s481_s21] ss:$0 sm:$0xff]  ;;  %s1132_s7 = scalar_lea.vmem %s1462_s27, 384  ;;  %p1139_p4 = scmp.lt.s32.totalorder %s1462_s27, %s1137_s8 }
  0x4d   : > { %1032 = vmatpush3.bf16.msra.mxu1 %v1115_v61  ;;  %995 = vmatprep.subr.bf16.mxu0 %v1117_v63  ;;  %p1133_p1 = scmp.ne.s32.totalorder %s1462_s27, %s1132_s7  ;;  %p1140_p6 = scmp.lt.s32.totalorder %s1138_s9, %s1132_s7 }
  0x4e   : > { %1033 = vmatprep.subr.bf16.mxu1 %v1118_v0 }
  0x4f   : > { %p1134_p2 = pnand %p1133_p1, %p1273_p5  ;;  %p1141_p7 = por %p1140_p6, %p1139_p4 }
  0x50   : > { %996 = vmatpush3.bf16.msra.mxu0 %v1119_v1 }
  0x51   : > { %1034 = vmatpush3.bf16.msra.mxu1 %v1118_v0  ;;  %997 = vmatprep.subr.bf16.mxu0 %v1120_v2  ;;  %p1135_p3 = pneg %p1134_p2 }
  0x52   : > { %1035 = vmatprep.subr.bf16.mxu1 %v1121_v3 }
  0x53   : > { %p1142_p8 = pnand %p1141_p7, %p1135_p3 }
  0x54   : > { %998 = vmatpush3.bf16.msra.mxu0 %v1122_v4 }
  0x55   : > { %1036 = vmatpush3.bf16.msra.mxu1 %v1121_v3  ;;  %999 = vmatprep.subr.bf16.mxu0 %v1123_v5 }
  0x56   : > { %1037 = vmatprep.subr.bf16.mxu1 %v1124_v6 }
  0x58   : > { %1000 = vmatpush3.bf16.msra.mxu0 %v1125_v7 }
  0x59   : > { %1038 = vmatpush3.bf16.msra.mxu1 %v1124_v6  ;;  %1001 = vmatprep.subr.bf16.mxu0 %v1126_v8 }
  0x5a   : > { %1039 = vmatprep.subr.bf16.mxu1 %v1127_v9 }
  0x5c   : > { %1002 = vmatpush3.bf16.msra.mxu0 %v1128_v10 }
  0x5d   : > { %1040 = vmatpush3.bf16.msra.mxu1 %v1127_v9  ;;  %1003 = vmatprep.subr.bf16.mxu0 %v1129_v11 }
  0x5e   : > { %1041 = vmatprep.subr.bf16.mxu1 %v1130_v12 }
  0x60   : > { %1004 = vmatpush3.bf16.msra.mxu0 %v1131_v14 }
  0x61   : > { %1042 = vmatpush3.bf16.msra.mxu1 %v1130_v12 }
  0x63   : > { %734 = vmatmul.mubr.bf16.vlgmr.msra.gmra.mxu0 %v503_v18 }
  0x64   : > { %1044 = vmatmul.mubr.bf16.vlgmr.msra.gmra.mxu1 %v508_v19  ;;  %741 = vmatprep.mubr.bf16.mxu0 %v507_v20 }
  0x6b   : > { %742 = vmatmul.mubr.bf16.gmra.mxu0 %v506_v22 }
 0x123   : > { %v1005_v23 = vpop.f32.mrf.mxu0 }
 0x124   : > { %v1045_v24 = vpop.f32.mrf.mxu1 }
 0x125   : > { %v1006_v25 = vpop.f32.mrf.mxu0 }
 0x126   : > { %v783_v26 = vpop.f32.mrf.mxu1  ;;  %v1007_v27 = vadd.f32 %v1006_v25, %v1005_v23 }
 0x127   : > { %v1008_v28 = vpop.f32.mrf.mxu0 }
 0x128   : > { %v1046_v29 = vpop.f32.mrf.mxu1  ;;  %v784_v30 = vadd.f32 %v1007_v27, %v783_v26 }
 0x129   : > { %v1009_v32 = vpop.f32.mrf.mxu0 }
 0x12a   : > { %v809_v33 = vmul.f32 0.05103104, %v784_v30  ;;  %v1010_v34 = vadd.f32 %v1009_v32, %v1008_v28  ;;  %v786_v35 = vpop.f32.mrf.mxu1 }
 0x12b   : > { %v1011_v36 = vpop.f32.mrf.mxu0 }
 0x12c   : > { %v819_v37 = vadd.f32 %v985_v31, %v809_v33  ;;  %v787_v38 = vadd.f32 %v1010_v34, %v786_v35 }
 0x12d   : > { %v1012_v39 = vpop.f32.mrf.mxu0 }
 0x12e   : > { %822 = vst [vmem:[%s465_s26] sm:$0xff] %v819_v37  ;;  %v810_v40 = vmul.f32 0.05103104, %v787_v38  ;;  %v1013_v41 = vadd.f32 %v1012_v39, %v1011_v36 }
 0x12f   : > { %v1014_v42 = vpop.f32.mrf.mxu0 }
 0x130   : > { %v820_v43 = vadd.f32 %v985_v31, %v810_v40  ;;  %v792_v44 = vadd.f32 %v1045_v24, %v1013_v41 }
 0x131   : > { %v1015_v45 = vpop.f32.mrf.mxu0 }
 0x132   : > { %823 = vst [vmem:[%s465_s26 + $0x8] sm:$0xff] %v820_v43  ;;  %v811_v46 = vmul.f32 0.05103104, %v792_v44 }
 0x134   : > { %v821_v47 = vadd.f32 %v985_v31, %v811_v46 }
 0x136   : > { %824 = vst [vmem:[%s465_s26 + $0x10] sm:$0xff] %v821_v47 }
 0x137   : > { %1145 = shalt.err (!%p1142_p8)
}
 0x138   : > { %s1146_s10 = scalar_lea.hbm %s1467_s4, 384  ;;  %s1150_s19 = scalar_lea.hbm %s1518_s3, 768 }
 0x139   : > { %p1147_p11 = scmp.ne.s32.totalorder %s1467_s4, %s1146_s10  ;;  %p1151_p0 = scmp.lt.s32.totalorder %s1467_s4, %s1518_s3 }
 0x13a   : > { %p1152_p1 = scmp.lt.s32.totalorder %s1150_s19, %s1146_s10 }
 0x13b   : > { %p1148_p12 = pnand %p1147_p11, %p1273_p5 }
 0x13c   : > { %p1153_p2 = por %p1152_p1, %p1151_p0 }
 0x13d   : > { %p1149_p13 = pneg %p1148_p12 }
 0x13f   : > { %p1154_p3 = pnand %p1153_p2, %p1149_p13 }
 0x141   : > { %1157 = shalt.err (!%p1154_p3)
}
 0x142   : > { %s1211_s26 = smov 128   ;;  %s1212_s28 = smov 256  }
 0x143   : > { %s1213_s29 = smov 8  }
 0x144   : > { %1050 = dma.vmem_to_hbm [thread:$0]  (%p1273_p5), %s1462_s27, 384, %s1467_s4, %s826_s5, %s1211_s26, %s1212_s28, %s1213_s29  }
 0x145 PF: > { %s856_s30 = sand.u32 1, %s1188_s12   ;;  %p1053_p4 = pnand %p958_p10, %p1284_p9 }
 0x146   : > { %s857_s7 = scalar_lea.sflag [#allocation5], %s856_s30 }
 0x147   : > { %p1054_p6 = pneg %p1053_p4 }
 0x149   : > { %1183 = dma.done.wait (%p1054_p6), %s857_s7, 384  }
 0x14a   : > { %1185 = vsyncadd (%p1054_p6), %s857_s7, 4294966912  ;;  %s16_s17 = sadd.s32 1, %s1208_s17   ;;  %s1521_s12 = smov %s1192_s13 }
 0x14b   : > { %p13_p7 = scmp.ge.s32.totalorder %s16_s17, 4   ;;  %s1522_s13 = smov %s1196_s14 }
 0x14c   : > { %s1523_s14 = smov %s1282_s24  ;;  %s1524_s15 = smov %s1204_s16 }
 0x14d   : > { %s1525_s16 = smov %s1527_s20  ;;  %15 = sbr.rel (!%p13_p7) target bundleno = 4 (0x4), region = 127 }
 0x152   :  { %862 = vsyncpa [#allocation5], 1 }
 0x153   :  { %864 = vsyncpa [#allocation5 + $0x1], 1 }

</bundles_post_ra>
